<compile_context>
chip_gen: v5e
topology: v5e:2x2
jax: 0.10.0
libtpu: 0.0.40
codegen_flags: <defaults>
</compile_context>

<pallas_src>
import math

import jax
import jax.numpy as jnp
import numpy as np
from jax.experimental import pallas as pl
from jax.experimental.pallas import tpu as pltpu


def _cdiv(a, b):
    return (a + b - 1) // b


def _detect_num_stat_shards():
    """2 pass-1 reduction shards on v7x-class chips (2 TensorCores), else 1."""
    try:
        kind = jax.devices()[0].device_kind.lower()
    except Exception:
        return 1
    return 2 if ("v7" in kind or "7x" in kind) else 1


def _stats_kernel(x_ref, m_ref, e_ref, stats_ref):
    """Masked per-feature sum / sum-of-squares, accumulated over row tiles.

    x_ref     : (TN, F) activations (native dtype, upcast to f32 here)
    m_ref     : (TN, K) per-folded-row 0/1 mask (f32)
    e_ref     : (K, F)  constant expander, E[j, f] = 1 iff f // H == j
    stats_ref : (2, F)  f32 accumulator [sum; sumsq], resident across axis 1
    """
    @pl.when(pl.program_id(1) == 0)
    def _():
        stats_ref[...] = jnp.zeros_like(stats_ref)

    x = x_ref[...].astype(jnp.float32)                       # (TN, F)
    # Expand the per-row mask to per-element on the idle MXU.
    m = jnp.dot(m_ref[...], e_ref[...], preferred_element_type=jnp.float32)
    # Select (not multiply): the boundary tile may read unspecified rows.
    xv = jnp.where(m > 0.0, x, 0.0)
    stats_ref[0:1, :] = stats_ref[0:1, :] + jnp.sum(xv, axis=0, keepdims=True)
    stats_ref[1:2, :] = stats_ref[1:2, :] + jnp.sum(xv * xv, axis=0, keepdims=True)


def _norm_kernel(x_ref, m_ref, e_ref, scale_ref, shift_ref, o_ref):
    """y = x*scale + shift at valid rows; pass-through x at padded rows."""
    x = x_ref[...].astype(jnp.float32)
    m = jnp.dot(m_ref[...], e_ref[...], preferred_element_type=jnp.float32)
    y = x * scale_ref[...] + shift_ref[...]                  # one FMA per element
    o_ref[...] = jnp.where(m > 0.0, y, x).astype(o_ref.dtype)


def rbatchnorm_with_lens(x, seq_lens, gamma, beta, *, eps=1e-5):
    """x: (B, T, H) float, seq_lens: (B,) int. Returns x_new of shape (B, T, H)."""
    B, T, H = x.shape
    N = B * T
    x_bytes = jnp.dtype(x.dtype).itemsize

    # ---- lane-dense folding (pure reshape, no copy): (N, H) -> (N/k, k*H) ----
    if H < 128:
        k = 128 // math.gcd(H, 128)      # k*H = lcm(H, 128), a multiple of 128
        k = math.gcd(k, N)               # must divide N so the reshape is a view
    else:
        k = 1
    # TODO(synk): when k*H ends up not a multiple of 128 (awkward H and N),
    #             pass-2 stores are partially lane-masked; a padded-feature
    #             fold would recover full store bandwidth.
    F = k * H
    n_fold = N // k

    # ---- tile sizing: ~2 MiB of x per block, multiple of 32 folded rows ----
    # Double-buffered pass-2 footprint ~ 4 * 2 MiB + mask/scale, which stays
    # under the default scoped-VMEM limits of v5e/v6e/v7x.
    tn = (2 * 1024 * 1024) // max(F * x_bytes, 1)
    tn = max(32, (tn // 32) * 32)
    if tn >= n_fold:
        tn = n_fold                      # single full-extent block for tiny inputs
    n_tiles = _cdiv(n_fold, tn)
    n_cover = n_tiles * tn               # rows covered by the grid (>= n_fold)

    # pass-1 reduction shards: both TensorCores on v7x, one elsewhere.
    n_shards = _detect_num_stat_shards()
    if n_tiles < n_shards or n_tiles % n_shards != 0:
        n_shards = 1
    steps = n_tiles // n_shards

    x_fold = x.reshape(n_fold, F)        # pure reshape view (no pad, no copy)

    # per-folded-row mask (n_cover, k) f32 -- ~1/H of the x read traffic.
    seq_lens_c = jnp.clip(seq_lens.astype(jnp.int32), 0, T)
    mask_row = jnp.arange(T, dtype=jnp.int32)[None, :] < seq_lens_c[:, None]
    m_fold = mask_row.reshape(n_fold, k).astype(jnp.float32)
    if n_cover > n_fold:
        m_fold = jnp.pad(m_fold, ((0, n_cover - n_fold), (0, 0)))

    # tiny constant expander E[j, f] = 1 iff f // H == j (used on the idle MXU)
    e_mat = (
        jnp.arange(F, dtype=jnp.int32)[None, :] // H
        == jnp.arange(k, dtype=jnp.int32)[:, None]
    ).astype(jnp.float32)

    # ---- pass 1: masked reduction -> per-shard (2, F) = [sum; sumsq] ----
    stats = pl.pallas_call(
        _stats_kernel,
        grid=(n_shards, steps),
        in_specs=[
            pl.BlockSpec((tn, F), lambda c, i: (c * steps + i, 0)),
            pl.BlockSpec((tn, k), lambda c, i: (c * steps + i, 0)),
            pl.BlockSpec((k, F), lambda c, i: (0, 0)),
        ],
        out_specs=pl.BlockSpec((None, 2, F), lambda c, i: (c, 0, 0)),
        out_shape=jax.ShapeDtypeStruct((n_shards, 2, F), jnp.float32),
        compiler_params=pltpu.CompilerParams(
            dimension_semantics=("parallel", "arbitrary")
        ),
    )(x_fold, m_fold, e_mat)

    # ---- finish statistics once, in plain JAX ----
    stats_h = stats.sum(axis=0).reshape(2, k, H).sum(axis=1)      # (2, H)
    cnt = jnp.maximum(jnp.sum(seq_lens_c).astype(jnp.float32), 1.0)
    mean = stats_h[0] / cnt
    var = jnp.maximum(stats_h[1] / cnt - mean * mean, 0.0)        # clamp cancellation
    inv_std = jax.lax.rsqrt(var + eps)
    scale_h = gamma.astype(jnp.float32) * inv_std
    shift_h = beta.astype(jnp.float32) - mean * scale_h
    scale_f = jnp.tile(scale_h, k).reshape(1, F)
    shift_f = jnp.tile(shift_h, k).reshape(1, F)

    # ---- pass 2: elementwise FMA + select (pass-through on padded rows) ----
    yf = pl.pallas_call(
        _norm_kernel,
        grid=(n_tiles,),
        in_specs=[
            pl.BlockSpec((tn, F), lambda i: (i, 0)),
            pl.BlockSpec((tn, k), lambda i: (i, 0)),
            pl.BlockSpec((k, F), lambda i: (0, 0)),
            pl.BlockSpec((1, F), lambda i: (0, 0)),
            pl.BlockSpec((1, F), lambda i: (0, 0)),
        ],
        out_specs=pl.BlockSpec((tn, F), lambda i: (i, 0)),
        out_shape=jax.ShapeDtypeStruct((n_fold, F), x.dtype),
        compiler_params=pltpu.CompilerParams(dimension_semantics=("parallel",)),
    )(x_fold, m_fold, e_mat, scale_f, shift_f)

    return yf.reshape(B, T, H)           # pure reshape back (no slice copy)


def _reference(x, seq_lens, gamma, beta, eps=1e-5):
    """Pure-numpy reference mirroring the PyTorch forward (training mode)."""
    x = np.asarray(x, dtype=np.float64)
    B, T, H = x.shape
    mask = np.arange(T)[None, :] < np.asarray(seq_lens)[:, None]   # (B, T) bool
    valid = x[mask]                                                # (Nv, H)
    mean = valid.mean(axis=0)
    var = valid.var(axis=0)                                        # biased, like BN
    x_new = x.copy()
    x_new[mask] = (valid - mean) / np.sqrt(var + eps) * np.asarray(
        gamma, np.float64
    ) + np.asarray(beta, np.float64)
    return x_new


if __name__ == "__main__":
    B, T, H = 2, 8, 32
    key = jax.random.PRNGKey(0)
    x = jax.random.normal(key, (B, T, H), dtype=jnp.float32)
    seq_lens = jnp.array([6, 3], dtype=jnp.int32)

    # BatchNorm1d(num_features=H) parameters (deterministic, non-trivial).
    gamma = 1.0 + 0.1 * jnp.arange(H, dtype=jnp.float32)   # default init would be ones
    beta = 0.05 * jnp.arange(H, dtype=jnp.float32)         # default init would be zeros

    fn = jax.jit(rbatchnorm_with_lens)
    out = jax.block_until_ready(fn(x, seq_lens, gamma, beta))

    ref = _reference(np.asarray(x), np.asarray(seq_lens), np.asarray(gamma), np.asarray(beta))
    assert out.shape == (B, T, H)
    np.testing.assert_allclose(np.asarray(out), ref, rtol=1e-4, atol=1e-4)
    print("KERNEL_OK")
</pallas_src>

<mosaic_0001>
module attributes {stable_mosaic.version = 11 : i64} {
  func.func @_norm_kernel(%arg0: i32, %arg1: memref<4x128xf32, #tpu.memory_space<vmem>>, %arg2: memref<4x4xf32, #tpu.memory_space<vmem>>, %arg3: memref<4x128xf32, #tpu.memory_space<vmem>>, %arg4: memref<1x128xf32, #tpu.memory_space<vmem>>, %arg5: memref<1x128xf32, #tpu.memory_space<vmem>>, %arg6: memref<4x128xf32, #tpu.memory_space<vmem>>) attributes {dimension_semantics = [#tpu.dimension_semantics<parallel>], iteration_bounds = array<i64: 1>, scalar_prefetch = 0 : i64, scratch_operands = 0 : i64, tpu.core_type = #tpu.core_type<tc>, window_params = [{transform_indices = @transform_0, window_bounds = array<i64: 4, 128>}, {transform_indices = @transform_1, window_bounds = array<i64: 4, 4>}, {pipeline_mode = #tpu.pipeline_mode<synchronous>, transform_indices = @transform_2, window_bounds = array<i64: 4, 128>}, {pipeline_mode = #tpu.pipeline_mode<synchronous>, transform_indices = @transform_3, window_bounds = array<i64: 1, 128>}, {pipeline_mode = #tpu.pipeline_mode<synchronous>, transform_indices = @transform_4, window_bounds = array<i64: 1, 128>}, {transform_indices = @transform_5, window_bounds = array<i64: 4, 128>}]} {
    %c0 = arith.constant 0 : index
    %c0_0 = arith.constant 0 : index
    %0 = vector.load %arg1[%c0, %c0_0] : memref<4x128xf32, #tpu.memory_space<vmem>>, vector<4x128xf32>
    %c0_1 = arith.constant 0 : index
    %c0_2 = arith.constant 0 : index
    %1 = vector.load %arg2[%c0_1, %c0_2] : memref<4x4xf32, #tpu.memory_space<vmem>>, vector<4x4xf32>
    %c0_3 = arith.constant 0 : index
    %c0_4 = arith.constant 0 : index
    %2 = vector.load %arg3[%c0_3, %c0_4] : memref<4x128xf32, #tpu.memory_space<vmem>>, vector<4x128xf32>
    %cst = arith.constant dense<0.000000e+00> : vector<4x128xf32>
    %3 = tpu.matmul %1, %2, %cst {dimension_numbers = #tpu.dot_dimension_numbers<[1], [0], [0], [1], [0, 0, 1, 1], [], []>} : vector<4x4xf32>, vector<4x128xf32>, vector<4x128xf32> -> vector<4x128xf32>
    %c0_5 = arith.constant 0 : index
    %c0_6 = arith.constant 0 : index
    %4 = vector.load %arg4[%c0_5, %c0_6] : memref<1x128xf32, #tpu.memory_space<vmem>>, vector<1x128xf32>
    %5 = vector.broadcast %4 : vector<1x128xf32> to vector<4x128xf32>
    %6 = arith.mulf %0, %5 : vector<4x128xf32>
    %c0_7 = arith.constant 0 : index
    %c0_8 = arith.constant 0 : index
    %7 = vector.load %arg5[%c0_7, %c0_8] : memref<1x128xf32, #tpu.memory_space<vmem>>, vector<1x128xf32>
    %8 = vector.broadcast %7 : vector<1x128xf32> to vector<4x128xf32>
    %9 = arith.addf %6, %8 : vector<4x128xf32>
    %cst_9 = arith.constant 0.000000e+00 : f32
    %10 = vector.broadcast %cst_9 : f32 to vector<4x128xf32>
    %11 = arith.cmpf ogt, %3, %10 : vector<4x128xf32>
    %12 = arith.select %11, %9, %0 : vector<4x128xi1>, vector<4x128xf32>
    %c0_10 = arith.constant 0 : index
    %c0_11 = arith.constant 0 : index
    %13 = vector.load %arg6[%c0_10, %c0_11] : memref<4x128xf32, #tpu.memory_space<vmem>>, vector<4x128xf32>
    tpu.vector_store %arg6[%c0_10, %c0_11], %12 {strides = array<i32>} : memref<4x128xf32, #tpu.memory_space<vmem>>, vector<4x128xf32>,
    return
  }
  func.func @transform_0(%arg0: i32) -> (i32, i32) {
    %c0_i32 = arith.constant 0 : i32
    %c0_i32_0 = arith.constant 0 : i32
    return %arg0, %c0_i32 : i32, i32
  }
  func.func @transform_1(%arg0: i32) -> (i32, i32) {
    %c0_i32 = arith.constant 0 : i32
    %c0_i32_0 = arith.constant 0 : i32
    return %arg0, %c0_i32 : i32, i32
  }
  func.func @transform_2(%arg0: i32) -> (i32, i32) {
    %c0_i32 = arith.constant 0 : i32
    %c0_i32_0 = arith.constant 0 : i32
    %c0_i32_1 = arith.constant 0 : i32
    return %c0_i32, %c0_i32_0 : i32, i32
  }
  func.func @transform_3(%arg0: i32) -> (i32, i32) {
    %c0_i32 = arith.constant 0 : i32
    %c0_i32_0 = arith.constant 0 : i32
    %c0_i32_1 = arith.constant 0 : i32
    return %c0_i32, %c0_i32_0 : i32, i32
  }
  func.func @transform_4(%arg0: i32) -> (i32, i32) {
    %c0_i32 = arith.constant 0 : i32
    %c0_i32_0 = arith.constant 0 : i32
    %c0_i32_1 = arith.constant 0 : i32
    return %c0_i32, %c0_i32_0 : i32, i32
  }
  func.func @transform_5(%arg0: i32) -> (i32, i32) {
    %c0_i32 = arith.constant 0 : i32
    %c0_i32_0 = arith.constant 0 : i32
    return %arg0, %c0_i32 : i32, i32
  }
}

module attributes {stable_mosaic.version = 11 : i64} {
  func.func @_stats_kernel(%arg0: i32, %arg1: i32, %arg2: memref<4x128xf32, #tpu.memory_space<vmem>>, %arg3: memref<4x4xf32, #tpu.memory_space<vmem>>, %arg4: memref<4x128xf32, #tpu.memory_space<vmem>>, %arg5: memref<1x2x128xf32, #tpu.memory_space<vmem>>) attributes {dimension_semantics = [#tpu.dimension_semantics<parallel>, #tpu.dimension_semantics<arbitrary>], iteration_bounds = array<i64: 1, 1>, scalar_prefetch = 0 : i64, scratch_operands = 0 : i64, tpu.core_type = #tpu.core_type<tc>, window_params = [{transform_indices = @transform_0, window_bounds = array<i64: 4, 128>}, {transform_indices = @transform_1, window_bounds = array<i64: 4, 4>}, {pipeline_mode = #tpu.pipeline_mode<synchronous>, transform_indices = @transform_2, window_bounds = array<i64: 4, 128>}, {transform_indices = @transform_3, window_bounds = array<i64: 1, 2, 128>}]} {
    %c0_i32 = arith.constant 0 : i32
    %0 = arith.cmpi eq, %arg1, %c0_i32 : i32
    %1 = arith.extui %0 : i1 to i32
    %c0_i32_0 = arith.constant 0 : i32
    %2 = arith.cmpi ne, %1, %c0_i32_0 : i32
    scf.if %2 {
      %cst_21 = arith.constant 0.000000e+00 : f32
      %28 = vector.broadcast %cst_21 : f32 to vector<2x128xf32>
      %c0_22 = arith.constant 0 : index
      %c0_23 = arith.constant 0 : index
      %c0_24 = arith.constant 0 : index
      %29 = vector.load %arg5[%c0_22, %c0_23, %c0_24] : memref<1x2x128xf32, #tpu.memory_space<vmem>>, vector<1x2x128xf32>
      %30 = vector.shape_cast %29 : vector<1x2x128xf32> to vector<2x128xf32>
      %31 = vector.shape_cast %28 : vector<2x128xf32> to vector<1x2x128xf32>
      tpu.vector_store %arg5[%c0_22, %c0_23, %c0_24], %31 {strides = array<i32>} : memref<1x2x128xf32, #tpu.memory_space<vmem>>, vector<1x2x128xf32>,
    } else {
    }
    %c0 = arith.constant 0 : index
    %c0_1 = arith.constant 0 : index
    %3 = vector.load %arg2[%c0, %c0_1] : memref<4x128xf32, #tpu.memory_space<vmem>>, vector<4x128xf32>
    %c0_2 = arith.constant 0 : index
    %c0_3 = arith.constant 0 : index
    %4 = vector.load %arg3[%c0_2, %c0_3] : memref<4x4xf32, #tpu.memory_space<vmem>>, vector<4x4xf32>
    %c0_4 = arith.constant 0 : index
    %c0_5 = arith.constant 0 : index
    %5 = vector.load %arg4[%c0_4, %c0_5] : memref<4x128xf32, #tpu.memory_space<vmem>>, vector<4x128xf32>
    %cst = arith.constant dense<0.000000e+00> : vector<4x128xf32>
    %6 = tpu.matmul %4, %5, %cst {dimension_numbers = #tpu.dot_dimension_numbers<[1], [0], [0], [1], [0, 0, 1, 1], [], []>} : vector<4x4xf32>, vector<4x128xf32>, vector<4x128xf32> -> vector<4x128xf32>
    %cst_6 = arith.constant 0.000000e+00 : f32
    %7 = vector.broadcast %cst_6 : f32 to vector<4x128xf32>
    %8 = arith.cmpf ogt, %6, %7 : vector<4x128xf32>
    %cst_7 = arith.constant 0.000000e+00 : f32
    %9 = vector.broadcast %cst_7 : f32 to vector<4x128xf32>
    %10 = arith.select %8, %3, %9 : vector<4x128xi1>, vector<4x128xf32>
    %c0_8 = arith.constant 0 : index
    %c0_9 = arith.constant 0 : index
    %c0_10 = arith.constant 0 : index
    %11 = vector.load %arg5[%c0_8, %c0_9, %c0_10] : memref<1x2x128xf32, #tpu.memory_space<vmem>>, vector<1x1x128xf32>
    %12 = vector.shape_cast %11 : vector<1x1x128xf32> to vector<1x128xf32>
    %cst_11 = arith.constant dense<0.000000e+00> : vector<128xf32>
    %13 = vector.multi_reduction <add>, %10, %cst_11 [0] : vector<4x128xf32> to vector<128xf32>
    %14 = vector.shape_cast %13 : vector<128xf32> to vector<1x128xf32>
    %15 = arith.addf %12, %14 : vector<1x128xf32>
    %c0_12 = arith.constant 0 : index
    %c0_13 = arith.constant 0 : index
    %c0_14 = arith.constant 0 : index
    %16 = vector.load %arg5[%c0_12, %c0_13, %c0_14] : memref<1x2x128xf32, #tpu.memory_space<vmem>>, vector<1x1x128xf32>
    %17 = vector.shape_cast %16 : vector<1x1x128xf32> to vector<1x128xf32>
    %18 = vector.shape_cast %15 : vector<1x128xf32> to vector<1x1x128xf32>
    tpu.vector_store %arg5[%c0_12, %c0_13, %c0_14], %18 {strides = array<i32>} : memref<1x2x128xf32, #tpu.memory_space<vmem>>, vector<1x1x128xf32>,
    %c0_15 = arith.constant 0 : index
    %c1 = arith.constant 1 : index
    %c0_16 = arith.constant 0 : index
    %19 = vector.load %arg5[%c0_15, %c1, %c0_16] : memref<1x2x128xf32, #tpu.memory_space<vmem>>, vector<1x1x128xf32>
    %20 = vector.shape_cast %19 : vector<1x1x128xf32> to vector<1x128xf32>
    %21 = arith.mulf %10, %10 : vector<4x128xf32>
    %cst_17 = arith.constant dense<0.000000e+00> : vector<128xf32>
    %22 = vector.multi_reduction <add>, %21, %cst_17 [0] : vector<4x128xf32> to vector<128xf32>
    %23 = vector.shape_cast %22 : vector<128xf32> to vector<1x128xf32>
    %24 = arith.addf %20, %23 : vector<1x128xf32>
    %c0_18 = arith.constant 0 : index
    %c1_19 = arith.constant 1 : index
    %c0_20 = arith.constant 0 : index
    %25 = vector.load %arg5[%c0_18, %c1_19, %c0_20] : memref<1x2x128xf32, #tpu.memory_space<vmem>>, vector<1x1x128xf32>
    %26 = vector.shape_cast %25 : vector<1x1x128xf32> to vector<1x128xf32>
    %27 = vector.shape_cast %24 : vector<1x128xf32> to vector<1x1x128xf32>
    tpu.vector_store %arg5[%c0_18, %c1_19, %c0_20], %27 {strides = array<i32>} : memref<1x2x128xf32, #tpu.memory_space<vmem>>, vector<1x1x128xf32>,
    return
  }
  func.func @transform_0(%arg0: i32, %arg1: i32) -> (i32, i32) {
    %c1_i32 = arith.constant 1 : i32
    %0 = arith.muli %arg0, %c1_i32 : i32
    %1 = arith.addi %0, %arg1 : i32
    %c0_i32 = arith.constant 0 : i32
    %c0_i32_0 = arith.constant 0 : i32
    return %1, %c0_i32 : i32, i32
  }
  func.func @transform_1(%arg0: i32, %arg1: i32) -> (i32, i32) {
    %c1_i32 = arith.constant 1 : i32
    %0 = arith.muli %arg0, %c1_i32 : i32
    %1 = arith.addi %0, %arg1 : i32
    %c0_i32 = arith.constant 0 : i32
    %c0_i32_0 = arith.constant 0 : i32
    return %1, %c0_i32 : i32, i32
  }
  func.func @transform_2(%arg0: i32, %arg1: i32) -> (i32, i32) {
    %c0_i32 = arith.constant 0 : i32
    %c0_i32_0 = arith.constant 0 : i32
    %c0_i32_1 = arith.constant 0 : i32
    return %c0_i32, %c0_i32_0 : i32, i32
  }
  func.func @transform_3(%arg0: i32, %arg1: i32) -> (i32, i32, i32) {
    %c0_i32 = arith.constant 0 : i32
    %c0_i32_0 = arith.constant 0 : i32
    %c0_i32_1 = arith.constant 0 : i32
    return %arg0, %c0_i32, %c0_i32_0 : i32, i32, i32
  }
}

</mosaic_0001>

<bundles_post_ra>
// kernel: tile.18
= control target key start
LH: loop header
LB: loop body
LE: loop exit
PB: predicated region body
PF: predicated region fallthrough
CT: control target
= control target key end

     0   :  { %s22_s0 = inlined_call_operand.vmem [shape: f32[32], index: 0, kind: input, shape index: {}]   ;;  %s23_s1 = inlined_call_operand.vmem [shape: f32[4,32], index: 1, kind: output, shape index: {}]  }
   0x1   :  { %v4_v0 = vld [vmem:[%s22_s0] ss:$0 sm:$0xff] }
   0x2   :  { %5 = vst [vmem:[%s23_s1] sm:$0xf] %v4_v0 }

// kernel: tile.19
= control target key start
LH: loop header
LB: loop body
LE: loop exit
PB: predicated region body
PF: predicated region fallthrough
CT: control target
= control target key end

     0   :  { %s37_s8 = smov 32   ;;  %s38_s9 = smov 64   ;;  %vm7_vm0 = vcmask 261120   ;;  %vm13_vm1 = vcmask 1048320   ;;  %vm19_vm2 = vcmask 785920   ;;  %vm25_vm3 = vcmask 523520   ;;  %s55_s0 = inlined_call_operand.vmem [shape: f32[4,32], index: 0, kind: input, shape index: {}]   ;;  %s56_s1 = inlined_call_operand.vmem [shape: f32[1,128], index: 1, kind: output, shape index: {}]  }
   0x1   :  { %v4_v0 = vld [vmem:[%s55_s0] sm:$0xf]  ;;  %s36_s0 = smov 96  }
   0x2   :  { %5 = vst [vmem:[#allocation1] sm:$0xf] %v4_v0 }
   0x9   :  { %v10_v1 = vld [vmem:[#allocation1 + $0x3] sm:$0x1]   ;;  %v22_v2 = vld [vmem:[#allocation1 + $0x1] sm:$0x1]   ;;  %v16_v3 = vld [vmem:[#allocation1 + $0x2] sm:$0x1]  }
   0xa   :  { %11 = vrot.lane.b32.xlu0 %v10_v1, %s36_s0  ;;  %23 = vrot.lane.b32.xlu1 %v22_v2, %s37_s8  ;;  %v6_v4 = vld [vmem:[#allocation1] sm:$0x1]  }
   0xb   :  { %8 = vst.msk [vmem:[#allocation0] sm:$0x1] %vm7_vm0, %v6_v4  }
  0x12   :  { %17 = vrot.lane.b32.xlu0 %v16_v3, %s38_s9 }
  0x7c   :  { %v12_v5 = vpop.permute.xlu0 %11   ;;  %v24_v6 = vpop.permute.xlu1 %23  }
  0x7d   :  { %14 = vst.msk [vmem:[#allocation0] sm:$0x1] %vm13_vm1, %v12_v5  }
  0x84   :  { %v18_v7 = vpop.permute.xlu0 %17  }
  0x85   :  { %20 = vst.msk [vmem:[#allocation0] sm:$0x1] %vm19_vm2, %v18_v7  }
  0x86   :  { %26 = vst.msk [vmem:[#allocation0] sm:$0x1] %vm25_vm3, %v24_v6  }
  0x8d   :  { %v29_v8 = vld [vmem:[#allocation0] sm:$0x1] }
  0x8e   :  { %32 = vst [vmem:[%s56_s1] sm:$0x1] %v29_v8 }

// kernel: rbatchnorm_with_lens.2
= control target key start
LH: loop header
LB: loop body
LE: loop exit
PB: predicated region body
PF: predicated region fallthrough
CT: control target
= control target key end

     0   :  { %vm60_vm0 = vcmask 1043456   ;;  %vm56_vm1 = vcmask 31744   ;;  %v126_v2 = vmov 0.0   ;;  %s174_s2 = inlined_call_operand.vmem [shape: f32[4,128], index: 2, kind: input, shape index: {}]   ;;  %s175_s1 = inlined_call_operand.vmem [shape: f32[4,4], index: 1, kind: input, shape index: {}]   ;;  %s176_s3 = inlined_call_operand.vmem [shape: f32[1,2,128], index: 3, kind: output, shape index: {}]   ;;  %s177_s0 = inlined_call_operand.vmem [shape: f32[4,128], index: 0, kind: input, shape index: {}]  }
   0x1   :  { %v55_v0 = vld [vmem:[%s174_s2] sm:$0xf]  ;;  %52 = vst [vmem:[%s176_s3] sm:$0x3] %v126_v2 }
   0x2   :  { %v54_v1 = vld [vmem:[%s175_s1] sm:$0xf]  ;;  %123 = vmatpush.msk.msra.mxu0 %vm60_vm0, %v55_v0 }
   0x3   :  { %124 = vmatmul.msk.f32.vlgmr.msra.gmra.mxu0 %vm56_vm1, %v54_v1  ;;  %v53_v3 = vld [vmem:[%s177_s0] sm:$0xf] }
   0x8   :  { %v86_v18 = vld [vmem:[%s176_s3] sm:$0x1]  ;;  %v96_v21 = vld [vmem:[%s176_s3 + $0x1] sm:$0x1] }
  0x80   :  { %v81_v4 = vpop.f32.mrf.mxu0 }
  0x81   :  { %vm84_vm2 = vcmp.gt.f32.partialorder %v81_v4, 0.0 }
  0x82   :  { %v85_v5 = vsel %vm84_vm2, %v53_v3, 0.0 }
  0x83   :  { %v87_v6 = vsel %vm60_vm0, %v85_v5, 0.0  ;;  %v97_v7 = vmul.f32 %v85_v5, %v85_v5 }
  0x84   :  { %v88_v8 = vrot.slane %v87_v6, 4 }
  0x85   :  { %v98_v9 = vsel %vm60_vm0, %v97_v7, 0.0 }
  0x86   :  { %v89_v10 = vadd.f32 %v88_v8, %v87_v6  ;;  %v99_v11 = vrot.slane %v98_v9, 4 }
  0x88   :  { %v90_v12 = vrot.slane %v89_v10, 2  ;;  %v100_v13 = vadd.f32 %v99_v11, %v98_v9 }
  0x8a   :  { %v91_v14 = vadd.f32 %v90_v12, %v89_v10  ;;  %v101_v15 = vrot.slane %v100_v13, 2 }
  0x8c   :  { %v92_v16 = vrot.slane %v91_v14, 1  ;;  %v102_v17 = vadd.f32 %v101_v15, %v100_v13 }
  0x8e   :  { %v93_v19 = vadd.f32 %v92_v16, %v91_v14  ;;  %v103_v20 = vrot.slane %v102_v17, 1 }
  0x90   :  { %v94_v22 = vadd.f32 %v93_v19, %v86_v18  ;;  %v104_v23 = vadd.f32 %v103_v20, %v102_v17 }
  0x92   :  { %95 = vst [vmem:[%s176_s3] sm:$0x1] %v94_v22  ;;  %v105_v24 = vadd.f32 %v104_v23, %v96_v21 }
  0x94   :  { %106 = vst [vmem:[%s176_s3 + $0x1] sm:$0x1] %v105_v24 }

// kernel: rbatchnorm_with_lens.3
= control target key start
LH: loop header
LB: loop body
LE: loop exit
PB: predicated region body
PF: predicated region fallthrough
CT: control target
= control target key end

     0   :  { %vm27_vm0 = vcmask 1043456   ;;  %vm23_vm1 = vcmask 31744   ;;  %s120_s2 = inlined_call_operand.vmem [shape: f32[4,128], index: 2, kind: input, shape index: {}]   ;;  %s121_s1 = inlined_call_operand.vmem [shape: f32[4,4], index: 1, kind: input, shape index: {}]   ;;  %s122_s3 = inlined_call_operand.vmem [shape: f32[1,128], index: 3, kind: input, shape index: {}]   ;;  %s123_s4 = inlined_call_operand.vmem [shape: f32[1,128], index: 4, kind: input, shape index: {}]   ;;  %s124_s0 = inlined_call_operand.vmem [shape: f32[4,128], index: 0, kind: input, shape index: {}]   ;;  %s125_s5 = inlined_call_operand.vmem [shape: f32[4,128], index: 5, kind: output, shape index: {}]  }
   0x1   :  { %v22_v0 = vld [vmem:[%s120_s2] sm:$0xf] }
   0x2   :  { %v21_v1 = vld [vmem:[%s121_s1] sm:$0xf]  ;;  %68 = vmatpush.msk.msra.mxu0 %vm27_vm0, %v22_v0 }
   0x3   :  { %69 = vmatmul.msk.f32.vlgmr.msra.gmra.mxu0 %vm23_vm1, %v21_v1  ;;  %v70_v2 = vld [vmem:[%s122_s3] ss:$0 sm:$0xff] }
   0x4   :  { %v20_v3 = vld [vmem:[%s124_s0] sm:$0xf] }
   0x5   :  { %v55_v4 = vmul.f32 %v70_v2, %v20_v3  ;;  %v71_v5 = vld [vmem:[%s123_s4] ss:$0 sm:$0xff] }
   0x7   :  { %v60_v6 = vadd.f32 %v71_v5, %v55_v4 }
  0x80   :  { %v48_v7 = vpop.f32.mrf.mxu0 }
  0x81   :  { %vm61_vm2 = vcmp.gt.f32.partialorder %v48_v7, 0.0 }
  0x82   :  { %v62_v8 = vsel %vm61_vm2, %v60_v6, %v20_v3 }
  0x83   :  { %63 = vst [vmem:[%s125_s5] sm:$0xf] %v62_v8 }

</bundles_post_ra>
